<compile_context>
chip_gen: v7x
topology: tpu7x:2x2x1
jax: 0.10.0
libtpu: 0.0.40
codegen_flags: <defaults>
</compile_context>

<pallas_src>
import jax
import jax.numpy as jnp
from jax.experimental import pallas as pl
from jax.experimental.pallas import tpu as pltpu


def _blockdiag_pw_conv_relu_kernel(w_ref, x_ref, o_ref):
    # w_ref: (R, K) block-diag weights + bias column
    # x_ref: (K, L) channel-stacked activations + ones row
    # o_ref: (R, L) lane-dense fused output
    acc = jnp.dot(w_ref[...], x_ref[...], preferred_element_type=jnp.float32)
    o_ref[...] = jnp.maximum(acc, 0.0).astype(o_ref.dtype)


def _round_up(v, m):
    return -(-v // m) * m


def additional_conv20_forward(params, x1, x2, x3):
    names = ("conv1", "conv2", "conv3")
    xs = (x1, x2, x3)
    ws = [params[n]["w"] for n in names]          # (Ci, Ci)
    bs = [params[n]["b"] for n in names]          # (Ci,)

    dtype = x1.dtype
    cs = [w.shape[0] for w in ws]
    lanes = [x.shape[0] * x.shape[2] * x.shape[3] for x in xs]   # N*H*W per branch
    c_total = sum(cs)                              # 112
    L = _round_up(max(lanes + [128]), 128)         # 128 lanes -> unmasked stores
    K = _round_up(c_total + 1, 8)                  # 120: channels + ones row, 8-aligned
    R = _round_up(c_total, 8)                      # 112 output rows, 8-aligned

    # ---- packed RHS (K, L): channel-stacked activations + ones (bias) row ----
    x_rows = []
    for x, c, li in zip(xs, cs, lanes):
        xr = jnp.transpose(x, (1, 0, 2, 3)).reshape(c, li)        # (Ci, N*H*W)
        x_rows.append(jnp.pad(xr, ((0, 0), (0, L - li))))
    x_rows.append(jnp.ones((1, L), dtype))                        # bias pick-up row
    x_packed = jnp.concatenate(x_rows, axis=0)
    x_packed = jnp.pad(x_packed, ((0, K - x_packed.shape[0]), (0, 0)))

    # ---- packed LHS (R, K): blockdiag(W1,W2,W3) with bias folded as column ----
    w_bands = []
    off = 0
    for w, b, c in zip(ws, bs, cs):
        band = jnp.zeros((c, K), dtype)
        band = band.at[:, off:off + c].set(w.astype(dtype))
        band = band.at[:, c_total].set(b.astype(dtype))
        w_bands.append(band)
        off += c
    w_packed = jnp.concatenate(w_bands, axis=0)
    w_packed = jnp.pad(w_packed, ((0, R - c_total), (0, 0)))

    itemsize = jnp.dtype(dtype).itemsize
    cost = pl.CostEstimate(
        flops=2 * R * K * L,
        transcendentals=0,
        bytes_accessed=(w_packed.size + x_packed.size + R * L) * itemsize,
    )

    out = pl.pallas_call(
        _blockdiag_pw_conv_relu_kernel,
        out_shape=jax.ShapeDtypeStruct((R, L), dtype),
        in_specs=[
            pl.BlockSpec(w_packed.shape, lambda: (0, 0),
                         memory_space=pltpu.MemorySpace.VMEM),
            pl.BlockSpec(x_packed.shape, lambda: (0, 0),
                         memory_space=pltpu.MemorySpace.VMEM),
        ],
        out_specs=pl.BlockSpec((R, L), lambda: (0, 0),
                               memory_space=pltpu.MemorySpace.VMEM),
        cost_estimate=cost,
    )(w_packed, x_packed)

    # ---- slice valid row-band x lane range per branch, restore NCHW ----
    ys = []
    off = 0
    for x, c, li in zip(xs, cs, lanes):
        band = out[off:off + c, :li]                               # (Ci, N*H*W)
        y = band.reshape(c, x.shape[0], x.shape[2], x.shape[3])
        ys.append(jnp.transpose(y, (1, 0, 2, 3)))
        off += c
    return tuple(ys)


def init_params(key):
    """Deterministic parameter init matching the module's shapes.

    conv1: 16->16, conv2: 32->32, conv3: 64->64 (all 1x1, bias=True).
    Weights stored squeezed as (C_out, C_in)."""
    params = {}
    for name, c in (("conv1", 16), ("conv2", 32), ("conv3", 64)):
        key, kw, kb = jax.random.split(key, 3)
        fan_in = c  # 1x1 kernel
        bound = 1.0 / jnp.sqrt(fan_in)
        params[name] = {
            "w": jax.random.uniform(kw, (c, c), jnp.float32, -bound, bound),
            "b": jax.random.uniform(kb, (c,), jnp.float32, -bound, bound),
        }
    return params


if __name__ == "__main__":
    key = jax.random.PRNGKey(0)
    key, k1, k2, k3, kp = jax.random.split(key, 5)

    # Small shapes consistent with CIFAR ResNet stage widths (16/32/64 ch).
    x1 = jax.random.normal(k1, (2, 16, 8, 8), jnp.float32)
    x2 = jax.random.normal(k2, (2, 32, 4, 4), jnp.float32)
    x3 = jax.random.normal(k3, (2, 64, 2, 2), jnp.float32)

    params = init_params(kp)

    fwd = jax.jit(additional_conv20_forward)
    y1, y2, y3 = fwd(params, x1, x2, x3)
    jax.block_until_ready((y1, y2, y3))

    # Sanity check against a plain-JAX reference (1x1 conv == channel einsum).
    def ref(x, w, b):
        out = jnp.einsum("nchw,oc->nohw", x, w) + b[None, :, None, None]
        return jnp.maximum(out, 0.0)

    assert jnp.allclose(y1, ref(x1, params["conv1"]["w"], params["conv1"]["b"]), atol=1e-5)
    assert jnp.allclose(y2, ref(x2, params["conv2"]["w"], params["conv2"]["b"]), atol=1e-5)
    assert jnp.allclose(y3, ref(x3, params["conv3"]["w"], params["conv3"]["b"]), atol=1e-5)
    assert y1.shape == x1.shape and y2.shape == x2.shape and y3.shape == x3.shape

    print("KERNEL_OK")
</pallas_src>

<mosaic_0001>
module attributes {stable_mosaic.version = 11 : i64} {
  func.func @_blockdiag_pw_conv_relu_kernel(%arg0: memref<112x120xf32, #tpu.memory_space<vmem>>, %arg1: memref<120x128xf32, #tpu.memory_space<vmem>>, %arg2: memref<112x128xf32, #tpu.memory_space<vmem>>) attributes {dimension_semantics = [], scalar_prefetch = 0 : i64, scratch_operands = 0 : i64, tpu.core_type = #tpu.core_type<tc>} {
    %c0 = arith.constant 0 : index
    %c0_0 = arith.constant 0 : index
    %0 = vector.load %arg0[%c0, %c0_0] : memref<112x120xf32, #tpu.memory_space<vmem>>, vector<112x120xf32>
    %c0_1 = arith.constant 0 : index
    %c0_2 = arith.constant 0 : index
    %1 = vector.load %arg1[%c0_1, %c0_2] : memref<120x128xf32, #tpu.memory_space<vmem>>, vector<120x128xf32>
    %cst = arith.constant dense<0.000000e+00> : vector<112x128xf32>
    %2 = tpu.matmul %0, %1, %cst {dimension_numbers = #tpu.dot_dimension_numbers<[1], [0], [0], [1], [0, 0, 1, 1], [], []>} : vector<112x120xf32>, vector<120x128xf32>, vector<112x128xf32> -> vector<112x128xf32>
    %cst_3 = arith.constant 0.000000e+00 : f32
    %3 = vector.broadcast %cst_3 : f32 to vector<112x128xf32>
    %4 = arith.maximumf %2, %3 : vector<112x128xf32>
    %c0_4 = arith.constant 0 : index
    %c0_5 = arith.constant 0 : index
    %5 = vector.load %arg2[%c0_4, %c0_5] : memref<112x128xf32, #tpu.memory_space<vmem>>, vector<112x128xf32>
    tpu.vector_store %arg2[%c0_4, %c0_5], %4 {strides = array<i32>} : memref<112x128xf32, #tpu.memory_space<vmem>>, vector<112x128xf32>,
    return
  }
}

</mosaic_0001>

<bundles_post_ra>
// kernel: additional_conv20_forward.1
= control target key start
LH: loop header
LB: loop body
LE: loop exit
PB: predicated region body
PF: predicated region fallthrough
CT: control target
= control target key end

     0   :  { %vm40_vm0 = vcmask 982016   ;;  %s546_s1 = inlined_call_operand.vmem [shape: f32[120,128], index: 1, kind: input, shape index: {}]   ;;  %s547_s0 = inlined_call_operand.vmem [shape: f32[112,120], index: 0, kind: input, shape index: {}]   ;;  %s548_s2 = inlined_call_operand.vmem [shape: f32[112,128], index: 2, kind: output, shape index: {}]  }
   0x1   :  { %v25_v0 = vld [vmem:[%s546_s1] sm:$0xff]  ;;  %v26_v1 = vld [vmem:[%s546_s1 + $0x8] sm:$0xff]  ;;  %v27_v2 = vld [vmem:[%s546_s1 + $0x10] sm:$0xff] }
   0x2   :  { %v344_v3 = vpack.c.bf16 %v26_v1, %v25_v0  ;;  %v28_v4 = vld [vmem:[%s546_s1 + $0x18] sm:$0xff]  ;;  %v29_v6 = vld [vmem:[%s546_s1 + $0x20] sm:$0xff]  ;;  %v30_v7 = vld [vmem:[%s546_s1 + $0x28] sm:$0xff] }
   0x3   :  { %v348_v5 = vpack.c.bf16 %v28_v4, %v27_v2  ;;  %v352_v8 = vpack.c.bf16 %v30_v7, %v29_v6  ;;  %v11_v9 = vld [vmem:[%s547_s0] sm:$0xff]  ;;  %v31_v11 = vld [vmem:[%s546_s1 + $0x30] sm:$0xff]  ;;  %v32_v12 = vld [vmem:[%s546_s1 + $0x38] sm:$0xff] }
   0x4   :  { %345 = vmatprep.subr.bf16.mxu0 %v344_v3  ;;  %372 = vmatprep.subr.bf16.mxu1 %v344_v3  ;;  %v19_v10 = vld [vmem:[%s547_s0 + $0x40] sm:$0xff]  ;;  %v356_v13 = vpack.c.bf16 %v32_v12, %v31_v11  ;;  %v34_v15 = vld [vmem:[%s546_s1 + $0x48] sm:$0xff]  ;;  %v35_v17 = vld [vmem:[%s546_s1 + $0x50] sm:$0xff] }
   0x5   :  { %347 = vmatpush3.bf16.msra.mxu0 %v344_v3  ;;  %380 = vmatpush3.bf16.msra.mxu1 %v344_v3  ;;  %v33_v14 = vld [vmem:[%s546_s1 + $0x40] sm:$0xff]  ;;  %v36_v18 = vld [vmem:[%s546_s1 + $0x58] sm:$0xff]  ;;  %v38_v21 = vld [vmem:[%s546_s1 + $0x68] sm:$0xff] }
   0x6   :  { %349 = vmatprep.subr.bf16.mxu0 %v348_v5  ;;  %373 = vmatprep.subr.bf16.mxu1 %v348_v5  ;;  %v360_v16 = vpack.c.bf16 %v34_v15, %v33_v14  ;;  %v364_v19 = vpack.c.bf16 %v36_v18, %v35_v17  ;;  %v37_v20 = vld [vmem:[%s546_s1 + $0x60] sm:$0xff]  ;;  %v39_v23 = vld [vmem:[%s546_s1 + $0x70] sm:$0xff]  ;;  %v12_v24 = vld [vmem:[%s547_s0 + $0x8] sm:$0xff] }
   0x7   :  { %323 = vmatprep.mubr.msk.f32.mxu0 %vm40_vm0, %v11_v9  ;;  %335 = vmatprep.mubr.msk.f32.mxu1 %vm40_vm0, %v19_v10  ;;  %v368_v22 = vpack.c.bf16 %v38_v21, %v37_v20  ;;  %v20_v25 = vld [vmem:[%s547_s0 + $0x48] sm:$0xff]  ;;  %v13_v26 = vld [vmem:[%s547_s0 + $0x10] sm:$0xff]  ;;  %v14_v28 = vld [vmem:[%s547_s0 + $0x18] sm:$0xff] }
   0x8   :  { %v21_v27 = vld [vmem:[%s547_s0 + $0x50] sm:$0xff]  ;;  %v22_v29 = vld [vmem:[%s547_s0 + $0x58] sm:$0xff]  ;;  %v15_v30 = vld [vmem:[%s547_s0 + $0x20] sm:$0xff] }
   0x9   :  { %351 = vmatpush3.bf16.msra.mxu0 %v348_v5  ;;  %381 = vmatpush3.bf16.msra.mxu1 %v348_v5  ;;  %v23_v31 = vld [vmem:[%s547_s0 + $0x60] sm:$0xff]  ;;  %v16_v32 = vld [vmem:[%s547_s0 + $0x28] sm:$0xff]  ;;  %v17_v34 = vld [vmem:[%s547_s0 + $0x30] sm:$0xff] }
   0xa   :  { %353 = vmatprep.subr.bf16.mxu0 %v352_v8  ;;  %374 = vmatprep.subr.bf16.mxu1 %v352_v8  ;;  %v24_v33 = vld [vmem:[%s547_s0 + $0x68] sm:$0xff]  ;;  %v18_v35 = vld [vmem:[%s547_s0 + $0x38] sm:$0xff] }
   0xd   :  { %355 = vmatpush3.bf16.msra.mxu0 %v352_v8  ;;  %382 = vmatpush3.bf16.msra.mxu1 %v352_v8 }
   0xe   :  { %357 = vmatprep.subr.bf16.mxu0 %v356_v13  ;;  %375 = vmatprep.subr.bf16.mxu1 %v356_v13 }
  0x11   :  { %359 = vmatpush3.bf16.msra.mxu0 %v356_v13  ;;  %383 = vmatpush3.bf16.msra.mxu1 %v356_v13 }
  0x12   :  { %361 = vmatprep.subr.bf16.mxu0 %v360_v16  ;;  %376 = vmatprep.subr.bf16.mxu1 %v360_v16 }
  0x15   :  { %363 = vmatpush3.bf16.msra.mxu0 %v360_v16  ;;  %384 = vmatpush3.bf16.msra.mxu1 %v360_v16 }
  0x16   :  { %365 = vmatprep.subr.bf16.mxu0 %v364_v19  ;;  %377 = vmatprep.subr.bf16.mxu1 %v364_v19 }
  0x19   :  { %367 = vmatpush3.bf16.msra.mxu0 %v364_v19  ;;  %385 = vmatpush3.bf16.msra.mxu1 %v364_v19 }
  0x1a   :  { %369 = vmatprep.subr.bf16.mxu0 %v368_v22  ;;  %378 = vmatprep.subr.bf16.mxu1 %v368_v22 }
  0x1d   :  { %371 = vmatpush3.bf16.msra.mxu0 %v368_v22  ;;  %386 = vmatpush3.bf16.msra.mxu1 %v368_v22 }
  0x1e   :  { %321 = vmatprep.subr.mxu0 %v39_v23  ;;  %379 = vmatprep.subr.mxu1 %v39_v23 }
  0x21   :  { %322 = vmatpush3.msra.mxu0 %v39_v23  ;;  %387 = vmatpush3.msra.mxu1 %v39_v23 }
  0x22   :  { %324 = vmatmul.mubr.msk.f32.vlgmr.msra.gmra.mrb[0].mxu0 %vm40_vm0, %v12_v24  ;;  %336 = vmatmul.mubr.msk.f32.vlgmr.msra.gmra.mrb[0].mxu1 %vm40_vm0, %v20_v25 }
  0x23   :  { %326 = vmatprep.mubr.msk.f32.mxu0 %vm40_vm0, %v13_v26  ;;  %338 = vmatprep.mubr.msk.f32.mxu1 %vm40_vm0, %v21_v27 }
  0x26   :  { %327 = vmatmul.mubr.msk.f32.gmra.mrb[2].mxu0 %vm40_vm0, %v14_v28  ;;  %339 = vmatmul.mubr.msk.f32.gmra.mrb[2].mxu1 %vm40_vm0, %v22_v29 }
  0x27   :  { %329 = vmatprep.mubr.msk.f32.mxu0 %vm40_vm0, %v15_v30  ;;  %341 = vmatprep.mubr.msk.f32.mxu1 %vm40_vm0, %v23_v31 }
  0x2a   :  { %330 = vmatmul.mubr.msk.f32.gmra.mrb[4].mxu0 %vm40_vm0, %v16_v32  ;;  %342 = vmatmul.mubr.msk.f32.gmra.mrb[4].mxu1 %vm40_vm0, %v24_v33 }
  0x2b   :  { %332 = vmatprep.mubr.msk.f32.mxu0 %vm40_vm0, %v17_v34 }
  0x2e   :  { %333 = vmatmul.mubr.msk.f32.gmra.mrb[6].mxu0 %vm40_vm0, %v18_v35 }
  0xf5   :  { %v325_v36 = vpop.f32.mrb[0].mxu0  ;;  %v337_v37 = vpop.f32.mrb[0].mxu1 }
  0xf6   :  { %v219_v38 = vmax.f32 %v325_v36, 0.0  ;;  %v149_v39 = vpop.f32.mrb[1].mxu0  ;;  %v227_v40 = vmax.f32 %v337_v37, 0.0  ;;  %v189_v41 = vpop.f32.mrb[1].mxu1 }
  0xf7   :  { %v218_v42 = vmax.f32 %v149_v39, 0.0  ;;  %v226_v43 = vmax.f32 %v189_v41, 0.0 }
  0xf8   :  { %233 = vst [vmem:[%s548_s2 + $0x8] sm:$0xff] %v219_v38  ;;  %241 = vst [vmem:[%s548_s2 + $0x48] sm:$0xff] %v227_v40 }
  0xf9   :  { %232 = vst [vmem:[%s548_s2] sm:$0xff] %v218_v42  ;;  %v328_v44 = vpop.f32.mrb[2].mxu0  ;;  %240 = vst [vmem:[%s548_s2 + $0x40] sm:$0xff] %v226_v43  ;;  %v340_v45 = vpop.f32.mrb[2].mxu1 }
  0xfa   :  { %v221_v46 = vmax.f32 %v328_v44, 0.0  ;;  %v159_v47 = vpop.f32.mrb[3].mxu0  ;;  %v229_v48 = vmax.f32 %v340_v45, 0.0  ;;  %v199_v49 = vpop.f32.mrb[3].mxu1 }
  0xfb   :  { %v220_v50 = vmax.f32 %v159_v47, 0.0  ;;  %v228_v51 = vmax.f32 %v199_v49, 0.0 }
  0xfc   :  { %235 = vst [vmem:[%s548_s2 + $0x18] sm:$0xff] %v221_v46  ;;  %243 = vst [vmem:[%s548_s2 + $0x58] sm:$0xff] %v229_v48 }
  0xfd   :  { %234 = vst [vmem:[%s548_s2 + $0x10] sm:$0xff] %v220_v50  ;;  %v331_v52 = vpop.f32.mrb[4].mxu0  ;;  %242 = vst [vmem:[%s548_s2 + $0x50] sm:$0xff] %v228_v51  ;;  %v343_v53 = vpop.f32.mrb[4].mxu1 }
  0xfe   :  { %v223_v54 = vmax.f32 %v331_v52, 0.0  ;;  %v169_v55 = vpop.f32.mrb[5].mxu0  ;;  %v231_v56 = vmax.f32 %v343_v53, 0.0  ;;  %v209_v57 = vpop.f32.mrb[5].mxu1 }
  0xff   :  { %v222_v58 = vmax.f32 %v169_v55, 0.0  ;;  %v230_v59 = vmax.f32 %v209_v57, 0.0 }
 0x100   :  { %237 = vst [vmem:[%s548_s2 + $0x28] sm:$0xff] %v223_v54  ;;  %245 = vst [vmem:[%s548_s2 + $0x68] sm:$0xff] %v231_v56 }
 0x101   :  { %236 = vst [vmem:[%s548_s2 + $0x20] sm:$0xff] %v222_v58  ;;  %v334_v60 = vpop.f32.mrb[6].mxu0  ;;  %244 = vst [vmem:[%s548_s2 + $0x60] sm:$0xff] %v230_v59 }
 0x102   :  { %v225_v61 = vmax.f32 %v334_v60, 0.0  ;;  %v179_v62 = vpop.f32.mrb[7].mxu0 }
 0x103   :  { %v224_v63 = vmax.f32 %v179_v62, 0.0 }
 0x104   :  { %239 = vst [vmem:[%s548_s2 + $0x38] sm:$0xff] %v225_v61 }
 0x105   :  { %238 = vst [vmem:[%s548_s2 + $0x30] sm:$0xff] %v224_v63 }

</bundles_post_ra>
